<compile_context>
chip_gen: v7x
topology: tpu7x:2x2x1
jax: 0.10.0
libtpu: 0.0.40
codegen_flags: <defaults>
</compile_context>

<pallas_src>
import functools

import jax
import jax.numpy as jnp
from jax.experimental import pallas as pl
from jax.experimental.pallas import tpu as pltpu

LANE = 128
VMEM_LIMIT = 48 * 1024 * 1024


def _round_up(x, m):
    return (x + m - 1) // m * m


# ---------------------------------------------------------------------------
# In-kernel helpers (operate on VMEM values; per-sample lists -> merged matmuls)
# ---------------------------------------------------------------------------
def _unfold(xs, K):
    """xs: list of per-sample (L, Cin) f32 values.  Returns merged (n*L, K*Cin)
    'same'-padded unfolded lhs so a K-tap stride-1 conv becomes one MXU matmul."""
    L, Cin = xs[0].shape
    pad = (K - 1) // 2
    rows = []
    for xb in xs:
        if pad:
            z = jnp.zeros((pad, Cin), xb.dtype)
            xb = jnp.concatenate([z, xb, z], axis=0)
        if K == 1:
            rows.append(xb)
        else:
            rows.append(jnp.concatenate([xb[k:k + L, :] for k in range(K)], axis=1))
    return rows[0] if len(rows) == 1 else jnp.concatenate(rows, axis=0)


def _unfold_stride2(xs, L_out):
    """xs: list of per-sample phase-split (Lh, 2C) f32 values (logical k=4, s=2, p=2 conv
    input, even-padded).  Returns merged (n*L_out, 4C) lhs for one matmul."""
    rows = []
    for xb in xs:
        Lh, C2 = xb.shape
        z = jnp.zeros((1, C2), xb.dtype)
        xp = jnp.concatenate([z, xb, z], axis=0)                       # (Lh+2, 2C)
        rows.append(jnp.concatenate([xp[0:L_out, :], xp[1:L_out + 1, :]], axis=1))
    return rows[0] if len(rows) == 1 else jnp.concatenate(rows, axis=0)


def _mm(lhs_f32, w_bf16, b_f32):
    """Single MXU matmul: bf16 operands, f32 accumulation, + bias row."""
    y = jnp.dot(lhs_f32.astype(jnp.bfloat16), w_bf16,
                preferred_element_type=jnp.float32)
    return y + b_f32


def _split(y, n, L):
    if n == 1:
        return [y]
    return [y[i * L:(i + 1) * L, :] for i in range(n)]


def _store(o_ref, ys, pad_rows):
    for i, y in enumerate(ys):
        if pad_rows:
            y = jnp.concatenate(
                [y, jnp.zeros((pad_rows, y.shape[1]), y.dtype)], axis=0)
        o_ref[i] = y.astype(o_ref.dtype)


# ---------------------------------------------------------------------------
# Fused kernels
# ---------------------------------------------------------------------------
def _head_kernel(x_ref, w1_ref, b1_ref, w2_ref, b2_ref, o_ref, *, pad_rows):
    """relu(conv1(x)) -> h1 ; relu(conv2(h1)) + h1 ; h1 never leaves VMEM."""
    Bt, L, _ = x_ref.shape
    xs = [x_ref[i] for i in range(Bt)]                                  # f32 (L, F)
    h1 = _split(jnp.maximum(_mm(_unfold(xs, 3), w1_ref[...], b1_ref[...]), 0.0), Bt, L)
    h2 = _split(_mm(_unfold(h1, 3), w2_ref[...], b2_ref[...]), Bt, L)
    h = [jnp.maximum(a, 0.0) + r for a, r in zip(h2, h1)]
    _store(o_ref, h, pad_rows)


def _downscale_kernel(h_ref, w3_ref, b3_ref, w4_ref, b4_ref, w5_ref, b5_ref,
                      o_ref, *, L_out, pad_rows):
    """Full DownscaleBlock: stride-2 conv + 2 residual convs, all intermediates in VMEM."""
    Bt = h_ref.shape[0]
    xs = [h_ref[i].astype(jnp.float32) for i in range(Bt)]              # (Lh, 2C)
    x3 = _split(jnp.maximum(
        _mm(_unfold_stride2(xs, L_out), w3_ref[...], b3_ref[...]), 0.0), Bt, L_out)
    x4m = _mm(_unfold(x3, 3), w4_ref[...], b4_ref[...])
    x4 = [jnp.maximum(a, 0.0) + r for a, r in zip(_split(x4m, Bt, L_out), x3)]
    x5m = _mm(_unfold(x4, 3), w5_ref[...], b5_ref[...])
    x5 = [jnp.maximum(a, 0.0) + r for a, r in zip(_split(x5m, Bt, L_out), x4)]
    _store(o_ref, x5, pad_rows)


def _resstack_kernel(x_ref, w1_ref, b1_ref, w2_ref, b2_ref, o_ref, *, n_layers):
    """Entire ResidualStack + outer relu(r)+x_pre, r carried in registers/VMEM."""
    Bt, L, _ = x_ref.shape
    x_pre = [x_ref[i].astype(jnp.float32) for i in range(Bt)]
    r = list(x_pre)
    for l in range(n_layers):                                           # static unroll
        t = _split(jnp.maximum(
            _mm(_unfold([jnp.maximum(v, 0.0) for v in r], 3), w1_ref[l], b1_ref[l]),
            0.0), Bt, L)
        u = _split(_mm(_unfold(t, 1), w2_ref[l], b2_ref[l]), Bt, L)
        r = [a + b for a, b in zip(r, u)]
    out = [jnp.maximum(a, 0.0) + b for a, b in zip(r, x_pre)]
    _store(o_ref, out, 0)


# ---------------------------------------------------------------------------
# pallas_call wrappers
# ---------------------------------------------------------------------------
def _compiler_params():
    return pltpu.CompilerParams(dimension_semantics=("parallel",),
                                vmem_limit_bytes=VMEM_LIMIT)


def _resident_spec(arr):
    nd = arr.ndim
    return pl.BlockSpec(arr.shape, lambda i, _n=nd: (0,) * _n)


def _act_spec(bt, L, C):
    return pl.BlockSpec((bt, L, C), lambda i: (i, 0, 0))


def _pick_bt(B, L, C):
    """Batch tile: bounded fused working set, >=2 grid steps when possible (v7x 2 TCs)."""
    per_sample = 12 * max(L, 8) * max(C, LANE) * 4
    bt = max(1, min(B, 8, (4 << 20) // per_sample))
    if B >= 2:
        bt = min(bt, max(1, B // 2))
    while B % bt:
        bt -= 1
    return bt


def _head(x, kp):
    B, T, F = x.shape
    C = kp["c_pad"]
    bt = _pick_bt(B, T, C)
    pad_rows = T % 2                      # even-pad so the next phase-split reshape is free
    T_store = T + pad_rows
    kern = functools.partial(_head_kernel, pad_rows=pad_rows)
    out = pl.pallas_call(
        kern,
        out_shape=jax.ShapeDtypeStruct((B, T_store, C), jnp.bfloat16),
        grid=(B // bt,),
        in_specs=[_act_spec(bt, T, F),
                  _resident_spec(kp["w1"]), _resident_spec(kp["b1"]),
                  _resident_spec(kp["w2"]), _resident_spec(kp["b2"])],
        out_specs=_act_spec(bt, T_store, C),
        compiler_params=_compiler_params(),
    )(x, kp["w1"], kp["b1"], kp["w2"], kp["b2"])
    return out, T


def _downscale(h_store, L_in, blk, C, last):
    B = h_store.shape[0]
    Lh = h_store.shape[1] // 2
    # Free contiguous dim-merge reshape: (B, L_even, C) -> (B, L_even/2, 2C) phase split.
    h_ph = h_store.reshape(B, Lh, 2 * C)
    L_out = L_in // 2 + 1
    pad_rows = 0 if last else (L_out % 2)
    L_store = L_out + pad_rows
    bt = _pick_bt(B, max(Lh, L_store), 2 * C)
    kern = functools.partial(_downscale_kernel, L_out=L_out, pad_rows=pad_rows)
    out = pl.pallas_call(
        kern,
        out_shape=jax.ShapeDtypeStruct((B, L_store, C), jnp.bfloat16),
        grid=(B // bt,),
        in_specs=[_act_spec(bt, Lh, 2 * C),
                  _resident_spec(blk["w3"]), _resident_spec(blk["b3"]),
                  _resident_spec(blk["w4"]), _resident_spec(blk["b4"]),
                  _resident_spec(blk["w5"]), _resident_spec(blk["b5"])],
        out_specs=_act_spec(bt, L_store, C),
        compiler_params=_compiler_params(),
    )(h_ph, blk["w3"], blk["b3"], blk["w4"], blk["b4"], blk["w5"], blk["b5"])
    return out, L_out


def _resstack(x_store, L, kp):
    B = x_store.shape[0]
    C = kp["c_pad"]
    nl = kp["res_w1"].shape[0]
    bt = _pick_bt(B, L, C)
    kern = functools.partial(_resstack_kernel, n_layers=nl)
    return pl.pallas_call(
        kern,
        out_shape=jax.ShapeDtypeStruct((B, L, C), jnp.float32),
        grid=(B // bt,),
        in_specs=[_act_spec(bt, L, C),
                  _resident_spec(kp["res_w1"]), _resident_spec(kp["res_b1"]),
                  _resident_spec(kp["res_w2"]), _resident_spec(kp["res_b2"])],
        out_specs=_act_spec(bt, L, C),
        compiler_params=_compiler_params(),
    )(x_store, kp["res_w1"], kp["res_b1"], kp["res_w2"], kp["res_b2"])


# ---------------------------------------------------------------------------
# Full SequenceEncoder forward
# ---------------------------------------------------------------------------
def sequence_encoder_forward(x, kp):
    """x: (B, T, feature_dim) f32.  Returns (flattened features, torch (B, C, L) shape)."""
    B = x.shape[0]
    C = kp["c_pad"]
    hidden = kp["hidden"]

    h_store, L = _head(x, kp)
    for bi, blk in enumerate(kp["blocks"]):
        h_store, L = _downscale(h_store, L, blk, C, last=(bi == len(kp["blocks"]) - 1))
    res = _resstack(h_store, L, kp)                 # (B, L, C_pad) f32

    # TODO(synk): channel-major flatten kept as tiny wrapper-side layout plumbing
    # (final tensor is only (B, L_f, hidden) elements).
    feat = res[:, :, :hidden]
    o = jnp.transpose(feat, (0, 2, 1)).reshape(B, hidden * L)
    return o, (B, hidden, L)


# ---------------------------------------------------------------------------
# Parameter init (logical, matches the torch module) + kernel-ready prep
# ---------------------------------------------------------------------------
def _init_conv(key, k, c_in, c_out):
    kw, kb = jax.random.split(key)
    w = jax.random.normal(kw, (k, c_in, c_out), jnp.float32) * (1.0 / (k * c_in) ** 0.5)
    b = jax.random.normal(kb, (c_out,), jnp.float32) * 0.05
    return w, b


def init_params(key, feature_dim, hidden_dim, residual_layers):
    keys = jax.random.split(key, 2 + 4 * 3 + residual_layers * 2)
    it = iter(keys)
    p = {}
    p["conv1_w"], p["conv1_b"] = _init_conv(next(it), 3, feature_dim, hidden_dim)
    p["conv2_w"], p["conv2_b"] = _init_conv(next(it), 3, hidden_dim, hidden_dim)
    p["blocks"] = []
    for _ in range(4):
        w3, b3 = _init_conv(next(it), 4, hidden_dim, hidden_dim)
        w4, b4 = _init_conv(next(it), 3, hidden_dim, hidden_dim)
        w5, b5 = _init_conv(next(it), 3, hidden_dim, hidden_dim)
        p["blocks"].append(dict(w3=w3, b3=b3, w4=w4, b4=b4, w5=w5, b5=b5))
    p["res_layers"] = []
    for _ in range(residual_layers):
        w1, b1 = _init_conv(next(it), 3, hidden_dim, hidden_dim)
        w2, b2 = _init_conv(next(it), 1, hidden_dim, hidden_dim)
        p["res_layers"].append(dict(w1=w1, b1=b1, w2=w2, b2=b2))
    return p


def prepare_params(params, feature_dim, hidden):
    """One-time prep: pad channels to a multiple of 128, flatten taps to (K*C_in, C_out),
    cast weights to bf16 (f32 biases).  Padded weight/bias lanes are zero so padded
    activation lanes stay identically zero through relu/residual epilogues."""
    C = _round_up(hidden, LANE)

    def w_flat(w, cin_pad):
        K, cin, cout = w.shape
        wp = jnp.zeros((K, cin_pad, C), jnp.float32).at[:, :cin, :cout].set(w)
        return wp.reshape(K * cin_pad, C).astype(jnp.bfloat16)

    def b_row(b):
        return jnp.zeros((1, C), jnp.float32).at[0, :b.shape[0]].set(b)

    kp = {"c_pad": C, "hidden": hidden}
    kp["w1"] = w_flat(params["conv1_w"], feature_dim)   # first conv keeps real C_in
    kp["b1"] = b_row(params["conv1_b"])
    kp["w2"] = w_flat(params["conv2_w"], C)
    kp["b2"] = b_row(params["conv2_b"])
    kp["blocks"] = [dict(w3=w_flat(b["w3"], C), b3=b_row(b["b3"]),
                         w4=w_flat(b["w4"], C), b4=b_row(b["b4"]),
                         w5=w_flat(b["w5"], C), b5=b_row(b["b5"]))
                    for b in params["blocks"]]
    kp["res_w1"] = jnp.stack([w_flat(l["w1"], C) for l in params["res_layers"]])
    kp["res_b1"] = jnp.stack([b_row(l["b1"]) for l in params["res_layers"]])
    kp["res_w2"] = jnp.stack([w_flat(l["w2"], C) for l in params["res_layers"]])
    kp["res_b2"] = jnp.stack([b_row(l["b2"]) for l in params["res_layers"]])
    return kp


# ---------------------------------------------------------------------------
# Pure-JAX reference (mirrors the torch module, channels-first, full precision)
# ---------------------------------------------------------------------------
def _ref_conv1d(x_cf, w_kio, b, stride, padding):
    w_oik = jnp.transpose(w_kio, (2, 1, 0))             # torch (C_out, C_in, K)
    y = jax.lax.conv_general_dilated(
        x_cf, w_oik, window_strides=(stride,), padding=[(padding, padding)],
        dimension_numbers=("NCH", "OIH", "NCH"),
        precision=jax.lax.Precision.HIGHEST)
    return y + b[None, :, None]


def _ref_forward(x_btf, p):
    x = jnp.transpose(x_btf, (0, 2, 1))                  # x.transpose(-1, -2)
    h1 = jax.nn.relu(_ref_conv1d(x, p["conv1_w"], p["conv1_b"], 1, 1))
    h = jax.nn.relu(_ref_conv1d(h1, p["conv2_w"], p["conv2_b"], 1, 1)) + h1
    for blk in p["blocks"]:
        x3 = jax.nn.relu(_ref_conv1d(h, blk["w3"], blk["b3"], 2, 2))
        x4 = jax.nn.relu(_ref_conv1d(x3, blk["w4"], blk["b4"], 1, 1)) + x3
        h = jax.nn.relu(_ref_conv1d(x4, blk["w5"], blk["b5"], 1, 1)) + x4
    x_pre = h
    r = x_pre
    for lyr in p["res_layers"]:
        t = _ref_conv1d(jax.nn.relu(r), lyr["w1"], lyr["b1"], 1, 1)
        r = r + _ref_conv1d(jax.nn.relu(t), lyr["w2"], lyr["b2"], 1, 0)
    xo = jax.nn.relu(r) + x_pre
    return xo.reshape(xo.shape[0], -1), xo.shape


if __name__ == "__main__":
    feature_dim, hidden_dim, latent_dim, residual_layers = 8, 32, 16, 2
    B, T = 2, 16

    root = jax.random.PRNGKey(0)
    k_x, k_p = jax.random.split(root)
    x = jax.random.normal(k_x, (B, T, feature_dim), dtype=jnp.float32)
    params = init_params(k_p, feature_dim, hidden_dim, residual_layers)
    kparams = prepare_params(params, feature_dim, hidden_dim)

    o, shp = sequence_encoder_forward(x, kparams)
    o = jax.block_until_ready(o)

    o_ref, shp_ref = _ref_forward(x, params)
    o_ref = jax.block_until_ready(o_ref)

    assert o.shape == o_ref.shape, (o.shape, o_ref.shape)
    assert tuple(shp) == tuple(shp_ref), (shp, shp_ref)
    assert bool(jnp.all(jnp.isfinite(o)))
    scale = float(jnp.max(jnp.abs(o_ref))) + 1e-6
    max_err = float(jnp.max(jnp.abs(o - o_ref)))
    assert max_err / scale < 5e-2, f"mismatch: max_err={max_err}, scale={scale}"

    print("KERNEL_OK")
</pallas_src>

<mosaic_0001>
module attributes {stable_mosaic.version = 11 : i64} {
  func.func @_head_kernel(%arg0: i32, %arg1: memref<1x16x8xf32, #tpu.memory_space<vmem>>, %arg2: memref<24x128xbf16, #tpu.memory_space<vmem>>, %arg3: memref<1x128xf32, #tpu.memory_space<vmem>>, %arg4: memref<384x128xbf16, #tpu.memory_space<vmem>>, %arg5: memref<1x128xf32, #tpu.memory_space<vmem>>, %arg6: memref<1x16x128xbf16, #tpu.memory_space<vmem>>) attributes {dimension_semantics = [#tpu.dimension_semantics<parallel>], iteration_bounds = array<i64: 2>, scalar_prefetch = 0 : i64, scratch_operands = 0 : i64, tpu.core_type = #tpu.core_type<tc>, window_params = [{transform_indices = @transform_0, window_bounds = array<i64: 1, 16, 8>}, {pipeline_mode = #tpu.pipeline_mode<synchronous>, transform_indices = @transform_1, window_bounds = array<i64: 24, 128>}, {pipeline_mode = #tpu.pipeline_mode<synchronous>, transform_indices = @transform_2, window_bounds = array<i64: 1, 128>}, {pipeline_mode = #tpu.pipeline_mode<synchronous>, transform_indices = @transform_3, window_bounds = array<i64: 384, 128>}, {pipeline_mode = #tpu.pipeline_mode<synchronous>, transform_indices = @transform_4, window_bounds = array<i64: 1, 128>}, {transform_indices = @transform_5, window_bounds = array<i64: 1, 16, 128>}]} {
    %c0 = arith.constant 0 : index
    %c0_0 = arith.constant 0 : index
    %c0_1 = arith.constant 0 : index
    %0 = vector.load %arg1[%c0, %c0_0, %c0_1] : memref<1x16x8xf32, #tpu.memory_space<vmem>>, vector<1x16x8xf32>
    %1 = vector.shape_cast %0 : vector<1x16x8xf32> to vector<16x8xf32>
    %cst = arith.constant 0.000000e+00 : f32
    %2 = vector.broadcast %cst : f32 to vector<1x8xf32>
    %3 = tpu.concatenate %2, %1, %2 in 0 : vector<1x8xf32>, vector<16x8xf32>, vector<1x8xf32> -> vector<18x8xf32>
    %4 = vector.extract_strided_slice %3 {offsets = [0, 0], sizes = [16, 8], strides = [1, 1]} : vector<18x8xf32> to vector<16x8xf32>
    %5 = vector.extract_strided_slice %3 {offsets = [1, 0], sizes = [16, 8], strides = [1, 1]} : vector<18x8xf32> to vector<16x8xf32>
    %6 = vector.extract_strided_slice %3 {offsets = [2, 0], sizes = [16, 8], strides = [1, 1]} : vector<18x8xf32> to vector<16x8xf32>
    %7 = tpu.concatenate %4, %5, %6 in 1 : vector<16x8xf32>, vector<16x8xf32>, vector<16x8xf32> -> vector<16x24xf32>
    %c0_2 = arith.constant 0 : index
    %c0_3 = arith.constant 0 : index
    %8 = vector.load %arg2[%c0_2, %c0_3] : memref<24x128xbf16, #tpu.memory_space<vmem>>, vector<24x128xbf16>
    %c0_4 = arith.constant 0 : index
    %c0_5 = arith.constant 0 : index
    %9 = vector.load %arg3[%c0_4, %c0_5] : memref<1x128xf32, #tpu.memory_space<vmem>>, vector<1x128xf32>
    %10 = arith.truncf %7 : vector<16x24xf32> to vector<16x24xbf16>
    %cst_6 = arith.constant dense<0.000000e+00> : vector<16x128xf32>
    %11 = tpu.matmul %10, %8, %cst_6 {dimension_numbers = #tpu.dot_dimension_numbers<[1], [0], [0], [1], [0, 0, 1, 1], [], []>} : vector<16x24xbf16>, vector<24x128xbf16>, vector<16x128xf32> -> vector<16x128xf32>
    %12 = vector.broadcast %9 : vector<1x128xf32> to vector<16x128xf32>
    %13 = arith.addf %11, %12 : vector<16x128xf32>
    %cst_7 = arith.constant 0.000000e+00 : f32
    %14 = vector.broadcast %cst_7 : f32 to vector<16x128xf32>
    %15 = arith.maximumf %13, %14 : vector<16x128xf32>
    %cst_8 = arith.constant 0.000000e+00 : f32
    %16 = vector.broadcast %cst_8 : f32 to vector<1x128xf32>
    %17 = tpu.concatenate %16, %15, %16 in 0 : vector<1x128xf32>, vector<16x128xf32>, vector<1x128xf32> -> vector<18x128xf32>
    %18 = vector.extract_strided_slice %17 {offsets = [0, 0], sizes = [16, 128], strides = [1, 1]} : vector<18x128xf32> to vector<16x128xf32>
    %19 = vector.extract_strided_slice %17 {offsets = [1, 0], sizes = [16, 128], strides = [1, 1]} : vector<18x128xf32> to vector<16x128xf32>
    %20 = vector.extract_strided_slice %17 {offsets = [2, 0], sizes = [16, 128], strides = [1, 1]} : vector<18x128xf32> to vector<16x128xf32>
    %21 = tpu.concatenate %18, %19, %20 in 1 : vector<16x128xf32>, vector<16x128xf32>, vector<16x128xf32> -> vector<16x384xf32>
    %c0_9 = arith.constant 0 : index
    %c0_10 = arith.constant 0 : index
    %22 = vector.load %arg4[%c0_9, %c0_10] : memref<384x128xbf16, #tpu.memory_space<vmem>>, vector<384x128xbf16>
    %c0_11 = arith.constant 0 : index
    %c0_12 = arith.constant 0 : index
    %23 = vector.load %arg5[%c0_11, %c0_12] : memref<1x128xf32, #tpu.memory_space<vmem>>, vector<1x128xf32>
    %24 = arith.truncf %21 : vector<16x384xf32> to vector<16x384xbf16>
    %cst_13 = arith.constant dense<0.000000e+00> : vector<16x128xf32>
    %25 = tpu.matmul %24, %22, %cst_13 {dimension_numbers = #tpu.dot_dimension_numbers<[1], [0], [0], [1], [0, 0, 1, 1], [], []>} : vector<16x384xbf16>, vector<384x128xbf16>, vector<16x128xf32> -> vector<16x128xf32>
    %26 = vector.broadcast %23 : vector<1x128xf32> to vector<16x128xf32>
    %27 = arith.addf %25, %26 : vector<16x128xf32>
    %cst_14 = arith.constant 0.000000e+00 : f32
    %28 = vector.broadcast %cst_14 : f32 to vector<16x128xf32>
    %29 = arith.maximumf %27, %28 : vector<16x128xf32>
    %30 = arith.addf %29, %15 : vector<16x128xf32>
    %31 = arith.truncf %30 : vector<16x128xf32> to vector<16x128xbf16>
    %c0_15 = arith.constant 0 : index
    %c0_16 = arith.constant 0 : index
    %c0_17 = arith.constant 0 : index
    %32 = vector.load %arg6[%c0_15, %c0_16, %c0_17] : memref<1x16x128xbf16, #tpu.memory_space<vmem>>, vector<1x16x128xbf16>
    %33 = vector.shape_cast %32 : vector<1x16x128xbf16> to vector<16x128xbf16>
    %34 = vector.shape_cast %31 : vector<16x128xbf16> to vector<1x16x128xbf16>
    tpu.vector_store %arg6[%c0_15, %c0_16, %c0_17], %34 {strides = array<i32>} : memref<1x16x128xbf16, #tpu.memory_space<vmem>>, vector<1x16x128xbf16>,
    return
  }
  func.func @transform_0(%arg0: i32) -> (i32, i32, i32) {
    %c0_i32 = arith.constant 0 : i32
    %c0_i32_0 = arith.constant 0 : i32
    %c0_i32_1 = arith.constant 0 : i32
    return %arg0, %c0_i32, %c0_i32_0 : i32, i32, i32
  }
  func.func @transform_1(%arg0: i32) -> (i32, i32) {
    %c0_i32 = arith.constant 0 : i32
    %c0_i32_0 = arith.constant 0 : i32
    %c0_i32_1 = arith.constant 0 : i32
    return %c0_i32, %c0_i32_0 : i32, i32
  }
  func.func @transform_2(%arg0: i32) -> (i32, i32) {
    %c0_i32 = arith.constant 0 : i32
    %c0_i32_0 = arith.constant 0 : i32
    %c0_i32_1 = arith.constant 0 : i32
    return %c0_i32, %c0_i32_0 : i32, i32
  }
  func.func @transform_3(%arg0: i32) -> (i32, i32) {
    %c0_i32 = arith.constant 0 : i32
    %c0_i32_0 = arith.constant 0 : i32
    %c0_i32_1 = arith.constant 0 : i32
    return %c0_i32, %c0_i32_0 : i32, i32
  }
  func.func @transform_4(%arg0: i32) -> (i32, i32) {
    %c0_i32 = arith.constant 0 : i32
    %c0_i32_0 = arith.constant 0 : i32
    %c0_i32_1 = arith.constant 0 : i32
    return %c0_i32, %c0_i32_0 : i32, i32
  }
  func.func @transform_5(%arg0: i32) -> (i32, i32, i32) {
    %c0_i32 = arith.constant 0 : i32
    %c0_i32_0 = arith.constant 0 : i32
    %c0_i32_1 = arith.constant 0 : i32
    return %arg0, %c0_i32, %c0_i32_0 : i32, i32, i32
  }
}

</mosaic_0001>

<bundles_post_ra>
// kernel: tpu_custom_call.1
= control target key start
LH: loop header
LB: loop body
LE: loop exit
PB: predicated region body
PF: predicated region fallthrough
CT: control target
= control target key end

     0   :  { %10 = vsyncpa [#allocation3], 0  ;;  %s1298_s0 = inlined_call_operand.vmem [shape: f32[2,16,8], index: 0, kind: input, shape index: {}]   ;;  %s1299_s1 = inlined_call_operand.vmem [shape: bf16[24,128], index: 1, kind: input, shape index: {}]   ;;  %s1300_s2 = inlined_call_operand.vmem [shape: f32[1,128], index: 2, kind: input, shape index: {}]   ;;  %s1301_s3 = inlined_call_operand.hbm [shape: bf16[384,128], index: 3, kind: input, shape index: {}]   ;;  %s1302_s4 = inlined_call_operand.vmem [shape: f32[1,128], index: 4, kind: input, shape index: {}]   ;;  %s1303_s5 = inlined_call_operand.hbm [shape: bf16[2,16,128], index: 5, kind: output, shape index: {}]  }
   0x1   :  { %11 = vsyncpa [#allocation4], 0 }
   0x2   :  { %13 = vsyncpa [#allocation4 + $0x1], 0  ;;  %s1119_s18 = smov 0   ;;  %s1121_s19 = smov 0  }
   0x3   :  { %s1123_s20 = smov 0   ;;  %s1125_s21 = smov 0  }
   0x4 LB: > { %s1140_s22 = sadd.s32 4294967295, %s1076_s21   ;;  %s767_s23 = sadd.s32 4294967294, %s1076_s21   ;;  %s1076_s21 = sphi %s1125_s21, %s1319_s21   ;;  %s1072_s20 = sphi %s1123_s20, %s1318_s20   ;;  %s1068_s19 = sphi %s1121_s19, %s1317_s19   ;;  %s1064_s18 = sphi %s1119_s18, %s1316_s18  }
   0x5   : > { %s1144_s24 = sadd.s32 1, %s1076_s21   ;;  %s136_s25 = sadd.s32 1, %s1072_s20 }
   0x6   : > { %s133_s26 = ssub.s32 %s1076_s21, %s1144_s24  ;;  %p146_p0 = scmp.ne.s32.totalorder %s1072_s20, %s1068_s19 }
   0x7   : > { %p134_p1 = scmp.eq.s32.totalorder %s133_s26, 0  ;;  %p147_p2 = scmp.eq.s32.totalorder %s1140_s22, 1 }
   0x8   : > { %p152_p3 = scmp.ne.s32.totalorder %s1068_s19, %s1064_s18  ;;  %p153_p4 = scmp.eq.s32.totalorder %s767_s23, 1 }
   0x9   : > { %s1155_s27 = scalar_select %p134_p1, %s1072_s20, %s136_s25  }
   0xa   : > { %p1157_p5 = por %p147_p2, %p146_p0  ;;  %p1161_p6 = por %p153_p4, %p152_p3 }
   0xb   : > { %p768_p7 = scmp.ge.s32.totalorder %s1076_s21, 1  ;;  %p160_p8 = scmp.lt.s32.totalorder %s1076_s21, 3 }
   0xc   : > { %s1307_s28 = scalar_select %p1157_p5, 1, 0 }
   0xd   : > { %s1308_s29 = scalar_select %p1161_p6, 1, 0 }
   0xe   : > { %p1304_p9 = scmp.eq.s32.totalorder %s1140_s22, 0  ;;  %p1168_p10 = pnand %p768_p7, %p160_p8 }
   0xf   : > { %s1078_s6 = smov [#allocation2]   ;;  %s982_s11 = scalar_lea.hbm %s1301_s3, 3072 }
  0x10   : > { %s1309_s30 = scalar_select %p1168_p10, 1, 0 }
  0x11   : > { %s178_s7 = sshll.u32 %s1078_s6, 4  ;;  %p893_p11 = pneg %p1168_p10  ;;  %s179_s7 = int_to_ptr.vmem [resolvable:$true] %s178_s7 }
  0x12   : > { %p983_p13 = scmp.ne.s32.totalorder %s1301_s3, %s982_s11  ;;  %p989_p3 = scmp.lt.u32.totalorder %s982_s11, %s1301_s3 }
  0x13   : > { %p1176_p12 = pnand %p1304_p9, %p893_p11 }
  0x15   : > { %p984_p0 = pneg %p1176_p12 }
  0x17   : > { %p985_p1 = pnand %p984_p0, %p983_p13 }
  0x19   : > { %p986_p2 = pneg %p985_p1 }
  0x1b   : > { %p991_p4 = pnand %p989_p3, %p986_p2 }
  0x1d   : > { %994 = shalt.err (!%p991_p4)
}
  0x1e   : > { %s995_s16 = scalar_lea.vmem %s179_s7, 3072  ;;  %p1003_p9 = scmp.lt.s32.totalorder %s179_s7, %s179_s7 }
  0x1f   : > { %p996_p7 = scmp.ne.s32.totalorder %s179_s7, %s995_s16  ;;  %p1004_p6 = scmp.lt.s32.totalorder %s995_s16, %s995_s16 }
  0x21   : > { %p998_p8 = pnand %p996_p7, %p984_p0  ;;  %p1005_p5 = por %p1004_p6, %p1003_p9 }
  0x23   : > { %p999_p11 = pneg %p998_p8 }
  0x25   : > { %p1006_p10 = pnand %p1005_p5, %p999_p11 }
  0x27   : > { %1009 = shalt.err (!%p1006_p10)
}
  0x28   : > { %s1079_s17 = smov 64   ;;  %s1080_s23 = smov 4  }
  0x29   : > { %896 = dma.hbm_to_vmem [thread:$0]  (!%p1176_p12), %s1301_s3, 3072, %s179_s7, [#allocation3], %s1079_s17, %s1079_s17, %s1080_s23  }
  0x2a   : > { %p1311_p13 = scmp.ne.s32.totalorder %s1309_s30, 0 }
  0x2b   : > { %p1312_p1 = scmp.eq.s32.totalorder (!%p1311_p13), %s1140_s22, 0 }
  0x2c   : > { %205 = sbr.rel (%p1311_p13) target bundleno = 660 (0x294), region = 40 }
  0x33   : > { %1055 = dma.done.wait (%p1312_p1), [#allocation3], 3072   ;;  %p1313_p0 = pmov %p1312_p1 }
  0x34   : > { %p233_p5 = scmp.lt.s32.totalorder %s1140_s22, 1  ;;  %v1081_v0 = vmov 0.0   ;;  %vm243_vm0 = vcmask 1040384   ;;  %vm254_vm1 = vcmask 1046528   ;;  %vm266_vm2 = vcmask 1045504   ;;  %v956_v5 = vld [vmem:[%s1299_s1] sm:$0xff]  }
  0x35   : > { %1057 = vsyncadd (%p1313_p0), [#allocation3], 4294964224  ;;  %859 = vmatprep.subr.bf16.mxu0 %v1081_v0  ;;  %vm308_vm3 = vcmask 1043456   ;;  %v957_v6 = vld [vmem:[%s1299_s1 + $0x8] ss:$0 sps:$4 sm:$0xff]   ;;  %vm1082_vm4 = vmmov 0  }
  0x36   : > { %s234_s6 = scalar_select %p233_p5, %s1140_s22, 1  ;;  %860 = vmatpush3.bf16.msra.mxu0 %v956_v5  ;;  %863 = vmatprep.mubr.msk.bf16.mxu0 %vm1082_vm4, %v1081_v0  ;;  %v310_v16 = vsel %vm308_vm3, %v957_v6, 0  ;;  %v958_v17 = vld [vmem:[#allocation2 + $0x40] sm:$0xff]   ;;  %v961_v24 = vld [vmem:[#allocation2 + $0x48] sm:$0xff]   ;;  %v964_v27 = vld [vmem:[#allocation2 + $0x50] sm:$0xff]   ;;  %vm278_vm5 = vcmask 64512  }
  0x37   : > { %861 = vmatprep.subr.bf16.mxu0 %v1081_v0  ;;  %828 = vmatprep.subr.bf16.mxu1 %v958_v17  ;;  %v960_v23 = vld [vmem:[#allocation2] sm:$0xff]   ;;  %s1083_s14 = smov 8   ;;  %v963_v26 = vld [vmem:[#allocation2 + $0x8] sm:$0xff]   ;;  %s1084_s15 = smov 16   ;;  %v966_v28 = vld [vmem:[#allocation2 + $0x10] sm:$0xff]   ;;  %vm281_vm6 = vcmask 130048  }
  0x38   : > { %s816_s9 = sshll.u32 %s234_s6, 4  ;;  %829 = vmatpush3.bf16.msra.mxu1 %v960_v23  ;;  %v967_v29 = vld [vmem:[#allocation2 + $0x58] sm:$0xff]   ;;  %vm304_vm7 = vcmask 195584   ;;  %v959_v41 = vld [vmem:[#allocation2 + $0x80] sm:$0xff]   ;;  %v962_v43 = vld [vmem:[#allocation2 + $0x88] sm:$0xff]   ;;  %vm1085_vm9 = vmmov 1  }
  0x39   : > { %s237_s7 = scalar_lea.vmem %s1298_s0, %s816_s9  ;;  %830 = vmatprep.subr.bf16.mxu1 %v961_v24  ;;  %v969_v30 = vld [vmem:[#allocation2 + $0x18] sm:$0xff]   ;;  %v965_v44 = vld [vmem:[#allocation2 + $0x90] sm:$0xff]   ;;  %v970_v46 = vld [vmem:[#allocation2 + $0x60] sm:$0xff]   ;;  %s230_s26 = sand.u32 1, %s1068_s19  }
  0x3a   : > { %v239_v1 = vld [vmem:[%s237_s7] sm:$0xff]  ;;  %v240_v2 = vld [vmem:[%s237_s7 + $0x8] sm:$0xff]  ;;  %862 = vmatpush3.bf16.msra.mxu0 %v310_v16  ;;  %v968_v45 = vld [vmem:[#allocation2 + $0x98] sm:$0xff]   ;;  %s773_s6 = sshll.u32 %s230_s26, 3  ;;  %s819_s9 = sshll.u32 %s1140_s22, 7 }
  0x3b   : > { %v244_v3 = vrot.slane %v239_v1, 7  ;;  %v245_v4 = vrot.slane %v240_v2, 7  ;;  %867 = vmatprep.subr.bf16.mxu0 %v1081_v0  ;;  %v971_v47 = vld [vmem:[#allocation2 + $0xa0] sm:$0xff]   ;;  %v973_v49 = vld [vmem:[#allocation2 + $0x68] sm:$0xff]   ;;  %v976_v52 = vld [vmem:[#allocation2 + $0x70] sm:$0xff]   ;;  %s232_s8 = scalar_lea.vmem [#allocation5], %s773_s6  ;;  %s1253_s11 = scalar_lea.hbm %s1303_s5, %s819_s9 }
  0x3c   : > { %831 = vmatpush3.bf16.msra.mxu1 %v963_v26  ;;  %v972_v48 = vld [vmem:[#allocation2 + $0x20] sm:$0xff]   ;;  %v974_v50 = vld [vmem:[#allocation2 + $0xa8] sm:$0xff]   ;;  %v977_v53 = vld [vmem:[#allocation2 + $0xb0] sm:$0xff]   ;;  %s693_s10 = sshll.u32 %s232_s8, 4  ;;  %s1257_s12 = scalar_lea.sflag [#allocation4], %s230_s26  ;;  %s1255_s10 = int_to_ptr.vmem [resolvable:$true] %s693_s10 }
  0x3d   : > { %v246_v7 = vsel %vm243_vm0, %v244_v3, %v245_v4  ;;  %v250_v8 = vsel %vm243_vm0, 0.0, %v244_v3  ;;  %v251_v9 = vsel %vm243_vm0, %v245_v4, 0.0  ;;  %832 = vmatprep.subr.bf16.mxu1 %v964_v27  ;;  %v975_v51 = vld [vmem:[#allocation2 + $0x28] sm:$0xff]   ;;  %v978_v54 = vld [vmem:[#allocation2 + $0x30] sm:$0xff]   ;;  %v979_v55 = vld [vmem:[#allocation2 + $0x78] sm:$0xff]   ;;  %s1010_s13 = scalar_lea.vmem %s1255_s10, 128 }
  0x3e   : > { %v255_v10 = vrot.slane %v250_v8, 1  ;;  %v256_v11 = vrot.slane %v246_v7, 1  ;;  %v258_v12 = vrot.slane %v251_v9, 1  ;;  %v270_v13 = vrot.slane %v251_v9, 2  ;;  %v980_v56 = vld [vmem:[#allocation2 + $0xb8] sm:$0xff]   ;;  %vm805_vm8 = vmneg %vm243_vm0  ;;  %p1011_p6 = scmp.ne.s32.totalorder %s1255_s10, %s1010_s13  ;;  %p1314_p9 = scmp.ne.s32.totalorder %s1307_s28, 0 }
  0x3f   : > { %v267_v14 = vrot.slane %v250_v8, 2  ;;  %v268_v15 = vrot.slane %v246_v7, 2  ;;  %v981_v57 = vld [vmem:[#allocation2 + $0x38] sm:$0xff]   ;;  %v776_v58 = vld [vmem:[%s1300_s2] ss:$0 sm:$0xff]  ;;  %vm806_vm10 = vmpackc.low %vm1085_vm9, %vm805_vm8  ;;  %s1086_s22 = smov [#allocation5]  }
  0x40   : > { %v257_v18 = vsel %vm254_vm1, %v255_v10, %v256_v11  ;;  %v259_v19 = vsel %vm254_vm1, %v256_v11, %v258_v12  ;;  %833 = vmatpush3.bf16.msra.mxu1 %v966_v28  ;;  %v780_v24 = vld [vmem:[%s1302_s4] ss:$0 sm:$0xff]  ;;  %p1012_p10 = pnand %p1011_p6, %p1314_p9 }
  0x41   : > { %v946_v20 = vpack.i.bf16 %v259_v19, %v257_v18  ;;  %v269_v21 = vsel %vm266_vm2, %v267_v14, %v268_v15  ;;  %v271_v22 = vsel %vm266_vm2, %v268_v15, %v270_v13  ;;  %834 = vmatprep.subr.bf16.mxu1 %v967_v29 }
  0x42   : > { %v951_v25 = vpack.i.bf16 %v271_v22, %v269_v21  ;;  %p1013_p12 = pneg %p1012_p10 }
  0x43   : > { %947 = vrot.lane.b32.xlu0 %v946_v20, %s1083_s14  ;;  %s1014_s14 = sshll.u32 %s1086_s22, 4  ;;  %s1015_s14 = int_to_ptr.vmem [resolvable:$false] %s1014_s14 }
  0x44   : > { %835 = vmatpush3.bf16.msra.mxu1 %v969_v30  ;;  %p1017_p2 = scmp.lt.s32.totalorder %s1255_s10, %s1015_s14 }
  0x45   : > { %836 = vmatprep.subr.bf16.mxu1 %v970_v46 }
  0x47   : > { %952 = vrot.lane.b32.xlu0 %v951_v25, %s1084_s15  ;;  %s1016_s15 = scalar_lea.vmem %s1015_s14, 256 }
  0x48   : > { %837 = vmatpush3.bf16.msra.mxu1 %v972_v48  ;;  %p1018_p3 = scmp.lt.s32.totalorder %s1016_s15, %s1010_s13 }
  0x49   : > { %838 = vmatprep.subr.bf16.mxu1 %v973_v49 }
  0x4a   : > { %p1019_p4 = por %p1018_p3, %p1017_p2 }
  0x4c   : > { %839 = vmatpush3.bf16.msra.mxu1 %v975_v51  ;;  %p1020_p7 = pnand %p1019_p4, %p1013_p12 }
  0x4d   : > { %840 = vmatprep.subr.bf16.mxu1 %v976_v52 }
  0x50   : > { %841 = vmatpush3.bf16.msra.mxu1 %v978_v54 }
  0x51   : > { %842 = vmatprep.subr.bf16.mxu1 %v979_v55 }
  0x54   : > { %843 = vmatpush3.bf16.msra.mxu1 %v981_v57 }
  0xb5   : > { %v948_v31 = vpop.permute.xlu0 %947 }
  0xb6   : > { %v950_v32 = vunpack.i.h.bf16 %v948_v31  ;;  %v949_v33 = vunpack.i.l.bf16 %v948_v31 }
  0xb8   : > { %v280_v37 = vsel %vm278_vm5, %v246_v7, %v950_v32  ;;  %v279_v38 = vsel %vm278_vm5, %v250_v8, %v949_v33 }
  0xb9   : > { %v953_v34 = vpop.permute.xlu0 %952 }
  0xba   : > { %v955_v35 = vunpack.i.h.bf16 %v953_v34  ;;  %v954_v36 = vunpack.i.l.bf16 %v953_v34 }
  0xbc   : > { %v282_v39 = vsel %vm281_vm6, %v279_v38, %v954_v36  ;;  %v283_v40 = vsel %vm281_vm6, %v280_v37, %v955_v35 }
  0xbd   : > { %v288_v42 = vpack.c.bf16 %v283_v40, %v282_v39 }
  0xbf   : > { %864 = vmatmul.mubr.msk.bf16.vlgmr.msra.gmra.mrb[0].mxu0 %vm304_vm7, %v288_v42 }
  0xc0   : > { %868 = vmatpush3.bf16.msra.mxu0 %v959_v41  ;;  %883 = vmatprep.mubr.msk.bf16.mxu0 %vm1082_vm4, %v1081_v0 }
  0xc1   : > { %869 = vmatprep.subr.bf16.mxu0 %v1081_v0 }
  0xc4   : > { %870 = vmatpush3.bf16.msra.mxu0 %v962_v43 }
  0xc5   : > { %871 = vmatprep.subr.bf16.mxu0 %v1081_v0 }
  0xc8   : > { %872 = vmatpush3.bf16.msra.mxu0 %v965_v44 }
  0xc9   : > { %873 = vmatprep.subr.bf16.mxu0 %v1081_v0 }
  0xcc   : > { %874 = vmatpush3.bf16.msra.mxu0 %v968_v45 }
  0xcd   : > { %875 = vmatprep.subr.bf16.mxu0 %v1081_v0 }
  0xd0   : > { %876 = vmatpush3.bf16.msra.mxu0 %v971_v47 }
  0xd1   : > { %877 = vmatprep.subr.bf16.mxu0 %v1081_v0 }
  0xd4   : > { %878 = vmatpush3.bf16.msra.mxu0 %v974_v50 }
  0xd5   : > { %879 = vmatprep.subr.bf16.mxu0 %v1081_v0 }
  0xd8   : > { %880 = vmatpush3.bf16.msra.mxu0 %v977_v53 }
  0xd9   : > { %881 = vmatprep.subr.bf16.mxu0 %v1081_v0 }
  0xdc   : > { %882 = vmatpush3.bf16.msra.mxu0 %v980_v56 }
 0x192   : > { %v346_v59 = vpop.f32.mrb[0].mxu0 }
 0x193   : > { %v347_v60 = vadd.f32 %v776_v58, %v346_v59  ;;  %v865_v61 = vpop.f32.mrb[1].mxu0 }
 0x194   : > { %v349_v62 = vpop.f32.mrb[2].mxu0 }
 0x195   : > { %v353_v63 = vmax.f32 %v347_v60, 0.0  ;;  %v350_v1 = vadd.f32 %v776_v58, %v349_v62  ;;  %v866_v2 = vpop.f32.mrb[3].mxu0 }
 0x197   : > { %v357_v3 = vrot.slane %v353_v63, 7  ;;  %v354_v4 = vmax.f32 %v350_v1, 0.0 }
 0x199   : > { %v358_v0 = vrot.slane %v354_v4, 7  ;;  %v363_v5 = vsel %vm243_vm0, 0.0, %v357_v3 }
 0x19a   : > { %v367_v8 = vrot.slane %v363_v5, 1  ;;  %v374_v9 = vrot.slane %v363_v5, 2 }
 0x19b   : > { %v359_v6 = vsel %vm243_vm0, %v357_v3, %v358_v0  ;;  %v364_v7 = vsel %vm243_vm0, %v358_v0, 0.0 }
 0x19c   : > { %v375_v10 = vrot.slane %v359_v6, 2  ;;  %v377_v11 = vrot.slane %v364_v7, 2  ;;  %v368_v12 = vrot.slane %v359_v6, 1  ;;  %v370_v13 = vrot.slane %v364_v7, 1 }
 0x19d   : > { %v807_v20 = vpack.c.bf16 %v359_v6, %v357_v3 }
 0x19e   : > { %v369_v14 = vsel %vm254_vm1, %v367_v8, %v368_v12  ;;  %v371_v15 = vsel %vm254_vm1, %v368_v12, %v370_v13  ;;  %v376_v16 = vsel %vm266_vm2, %v374_v9, %v375_v10  ;;  %v378_v17 = vsel %vm266_vm2, %v375_v10, %v377_v11 }
 0x19f   : > { %v431_v18 = vpack.c.bf16 %v371_v15, %v369_v14  ;;  %v432_v19 = vpack.c.bf16 %v378_v17, %v376_v16 }
 0x1a1   : > { %615 = vmatprep.mubr.bf16.mxu1 %v431_v18  ;;  %884 = vmatmul.mubr.bf16.vlgmr.msra.gmra.mrb[4].mxu0 %v432_v19 }
 0x1a2   : > { %808 = vmatmul.mubr.msk.bf16.vlgmr.msra.gmra.mrb[0].mxu1 %vm806_vm10, %v807_v20 }
 0x274   : > { %v658_v21 = vpop.f32.mrb[4].mxu0 }
 0x275   : > { %v844_v22 = vpop.f32.mrb[0].mxu1  ;;  %v885_v23 = vpop.f32.mrb[5].mxu0 }
 0x276   : > { %v845_v25 = vpop.f32.mrb[1].mxu1  ;;  %v661_v26 = vpop.f32.mrb[6].mxu0 }
 0x277   : > { %v846_v27 = vadd.f32 %v845_v25, %v844_v22  ;;  %v847_v28 = vpop.f32.mrb[2].mxu1  ;;  %v886_v29 = vpop.f32.mrb[7].mxu0 }
 0x278   : > { %v848_v30 = vpop.f32.mrb[3].mxu1 }
 0x279   : > { %v618_v31 = vadd.f32 %v846_v27, %v780_v24  ;;  %v849_v32 = vadd.f32 %v848_v30, %v847_v28 }
 0x27b   : > { %v659_v33 = vadd.f32 %v658_v21, %v618_v31  ;;  %v621_v34 = vadd.f32 %v849_v32, %v780_v24 }
 0x27d   : > { %v665_v35 = vmax.f32 %v659_v33, 0.0  ;;  %v662_v36 = vadd.f32 %v661_v26, %v621_v34 }
 0x27f   : > { %v666_v37 = vmax.f32 %v662_v36, 0.0  ;;  %v667_v38 = vadd.f32 %v665_v35, %v353_v63 }
 0x281   : > { %v668_v39 = vadd.f32 %v666_v37, %v354_v4 }
 0x283   : > { %v823_v40 = vpack.c.bf16 %v668_v39, %v667_v38 }
 0x285   : > { %824 = vst [vmem:[%s232_s8] sm:$0xff] %v823_v40  }
 0x286   : > { %1023 = shalt.err (!%p1020_p7)
}
 0x287   : > { %s1024_s16 = scalar_lea.hbm %s1253_s11, 128  ;;  %s1028_s25 = scalar_lea.hbm %s1303_s5, 256 }
 0x288   : > { %p1025_p8 = scmp.ne.s32.totalorder %s1253_s11, %s1024_s16  ;;  %p1029_p1 = scmp.lt.u32.totalorder %s1253_s11, %s1303_s5 }
 0x289   : > { %p1030_p0 = scmp.lt.u32.totalorder %s1028_s25, %s1024_s16  ;;  %p1032_p6 = scmp.lt.u32.totalorder %s1024_s16, %s1253_s11 }
 0x28a   : > { %p1026_p11 = pnand %p1025_p8, %p1314_p9 }
 0x28b   : > { %p1031_p5 = por %p1030_p0, %p1029_p1 }
 0x28c   : > { %p1027_p13 = pneg %p1026_p11 }
 0x28d   : > { %p1033_p10 = por %p1032_p6, %p1031_p5 }
 0x28f   : > { %p1034_p12 = pnand %p1033_p10, %p1027_p13 }
 0x291   : > { %1037 = shalt.err (!%p1034_p12)
}
 0x292   : > { %s1087_s9 = smov 64   ;;  %s1088_s8 = smov 4  }
 0x293   : > { %891 = dma.vmem_to_hbm [thread:$0]  (%p1314_p9), %s1255_s10, 128, %s1253_s11, %s1257_s12, %s1087_s9, %s1087_s9, %s1088_s8  }
 0x294 PF: > { %p903_p2 = scmp.ge.s32.totalorder %s1076_s21, 2  ;;  %s708_s7 = sand.u32 1, %s1064_s18  }
 0x295   : > { %p1315_p3 = scmp.ne.s32.totalorder %s1308_s29, 0  ;;  %s709_s30 = scalar_lea.sflag [#allocation4], %s708_s7 }
 0x297   : > { %p898_p4 = pnand %p903_p2, %p1315_p3 }
 0x299   : > { %1059 = dma.done.wait (!%p898_p4), %s709_s30, 128  }
 0x29a   : > { %1061 = vsyncadd (!%p898_p4), %s709_s30, 4294967168  ;;  %p16_p7 = scmp.ge.s32.totalorder %s1144_s24, 4   ;;  %s1316_s18 = smov %s1068_s19 }
 0x29b   : > { %s1317_s19 = smov %s1072_s20  ;;  %s1318_s20 = smov %s1155_s27 }
 0x29c   : > { %s1319_s21 = smov %s1144_s24  ;;  %18 = sbr.rel (!%p16_p7) target bundleno = 4 (0x4), region = 80 }
 0x2a3   :  { %714 = vsyncpa [#allocation3], 1 }
 0x2a4   :  { %716 = vsyncpa [#allocation3 + $0x1], 1 }
 0x2a5   :  { %717 = vsyncpa [#allocation4], 1 }
 0x2a6   :  { %719 = vsyncpa [#allocation4 + $0x1], 1 }

</bundles_post_ra>
